<compile_context>
chip_gen: v7x
topology: tpu7x:2x2x1
jax: 0.10.0
libtpu: 0.0.40
codegen_flags: <defaults>
</compile_context>

<pallas_src>
import functools

import jax
import jax.numpy as jnp
from jax.experimental import pallas as pl
from jax.experimental.pallas import tpu as pltpu

LANE = 128
SUBLANE = 8
TARGET_TILE_BYTES = 2 * 1024 * 1024  # ~2 MiB per tile in native bytes


def _round_up(v, m):
    return -(-v // m) * m


def _swisht_c_kernel(params_ref, x_ref, o_ref, *, compute_dtype):
    # params_ref: SMEM f32[3] = [0.5*beta, 2*alpha/beta, alpha/beta]
    # x_ref / o_ref: (block_rows, LANE) VMEM tiles in the native dtype.
    half_beta = params_ref[0].astype(compute_dtype)
    two_c = params_ref[1].astype(compute_dtype)
    c = params_ref[2].astype(compute_dtype)
    x = x_ref[...].astype(compute_dtype)
    # sigmoid(b*x) == 0.5 * tanh(0.5*b*x) + 0.5  -> single EUP op + VALU.
    sig = jnp.tanh(half_beta * x) * 0.5 + 0.5
    y = sig * (x + two_c) - c
    o_ref[...] = y.astype(o_ref.dtype)


def _pick_compute_dtype(dtype):
    """bf16 math only where the VPU/EUP supports it (v6e / v7x); else f32."""
    if dtype != jnp.bfloat16:
        return jnp.float32
    try:
        kind = jax.devices()[0].device_kind.lower()
    except Exception:
        return jnp.float32
    if any(tag in kind for tag in ("v6", "v7", "tpu6", "tpu7")):
        return jnp.bfloat16
    return jnp.float32


def swisht_c(x, beta, alpha=0.1):
    """Apply SwishT_C elementwise. x: any shape (e.g. NCHW), beta: shape (1,)."""
    orig_shape = x.shape
    dtype = x.dtype
    n = x.size
    itemsize = jnp.dtype(dtype).itemsize

    # Lane-dense (rows, 128) slab; pad only to a multiple of LANE.
    x_flat = x.reshape(-1)
    rem = n % LANE
    padded = n
    if rem:
        # Unaligned tail (<128 elems): pad + final slice cost ~2 extra HBM
        # passes (pallas_call is a fusion barrier).  128-aligned shapes skip
        # this path entirely.
        padded = n + (LANE - rem)
        x_flat = jnp.pad(x_flat, (0, padded - n))
    rows = padded // LANE
    x2d = x_flat.reshape(rows, LANE)

    # Row block: ~2 MiB per tile in native bytes (4096 f32 / 8192 bf16 rows),
    # multiple of SUBLANE.  Double-buffered in+out = ~8 MiB of VMEM.
    target_rows = max(
        SUBLANE, ((TARGET_TILE_BYTES // (LANE * itemsize)) // SUBLANE) * SUBLANE
    )
    block_rows = min(target_rows, _round_up(rows, SUBLANE))
    # If everything fits in one tile but there is work for two, split so the
    # "parallel" grid axis can shard across both TensorCores on v7x.
    if block_rows >= rows and rows > SUBLANE:
        block_rows = max(SUBLANE, _round_up(pl.cdiv(rows, 2), SUBLANE))
    grid = (pl.cdiv(rows, block_rows),)

    # Hoisted scalars: [0.5*beta, 2*alpha/beta, alpha/beta] in SMEM.
    beta_s = jnp.asarray(beta, jnp.float32).reshape(())
    c = jnp.float32(alpha) / beta_s
    params = jnp.stack([0.5 * beta_s, 2.0 * c, c])

    compute_dtype = _pick_compute_dtype(dtype)
    kernel = functools.partial(_swisht_c_kernel, compute_dtype=compute_dtype)

    out2d = pl.pallas_call(
        kernel,
        out_shape=jax.ShapeDtypeStruct((rows, LANE), dtype),
        grid=grid,
        in_specs=[
            pl.BlockSpec(memory_space=pltpu.MemorySpace.SMEM),   # params
            pl.BlockSpec((block_rows, LANE), lambda i: (i, 0)),  # x tile
        ],
        out_specs=pl.BlockSpec((block_rows, LANE), lambda i: (i, 0)),
        compiler_params=pltpu.CompilerParams(
            dimension_semantics=("parallel",),
            # Explicit limit: safe on all generations (>=64 MiB physical) and
            # gives headroom above v5e's 16 MiB scoped default for the
            # double-buffered tiles + Mosaic f32-intermediate scratch.
            vmem_limit_bytes=32 * 1024 * 1024,
        ),
        cost_estimate=pl.CostEstimate(
            flops=6 * padded,
            transcendentals=padded,
            bytes_accessed=2 * padded * itemsize,
        ),
    )(params, x2d)

    out_flat = out2d.reshape(-1)
    if rem:
        out_flat = out_flat[:n]
    return out_flat.reshape(orig_shape)


def _reference(x, beta, alpha):
    b = beta[0]
    return jax.nn.sigmoid(b * x) * (x + 2.0 * alpha / b) - alpha / b


if __name__ == "__main__":
    key = jax.random.PRNGKey(0)
    alpha = 0.1
    beta = jnp.array([1.0], dtype=jnp.float32)  # matches nn.Parameter([1.0])

    # NCHW f32 input (2*4*16*16 = 2048 elems; 128-aligned -> no pad/slice).
    x = jax.random.normal(key, (2, 4, 16, 16), dtype=jnp.float32)
    y = jax.block_until_ready(swisht_c(x, beta, alpha=alpha))
    y_ref = _reference(x, beta, alpha)
    assert y.shape == x.shape and y.dtype == x.dtype
    # tanh-form sigmoid vs jax.nn.sigmoid: agree to a few ULPs in f32.
    assert jnp.allclose(y, y_ref, atol=1e-5, rtol=1e-5)

    # Unaligned / padded path, native bf16 I/O (bf16 math on v6e/v7x).
    x2 = jax.random.normal(jax.random.PRNGKey(1), (3, 5, 7), dtype=jnp.bfloat16)
    y2 = jax.block_until_ready(swisht_c(x2, beta, alpha=alpha))
    y2_ref = _reference(x2.astype(jnp.float32), beta, alpha).astype(jnp.bfloat16)
    assert y2.shape == x2.shape and y2.dtype == x2.dtype
    # Generous tolerance: bf16 end-to-end math compounds ~0.4% per op.
    assert jnp.allclose(y2.astype(jnp.float32), y2_ref.astype(jnp.float32),
                        atol=5e-2, rtol=5e-2)

    print("KERNEL_OK")
</pallas_src>

<mosaic_0001>
module attributes {stable_mosaic.version = 11 : i64} {
  func.func @_swisht_c_kernel(%arg0: i32, %arg1: memref<3xf32, #tpu.memory_space<smem>>, %arg2: memref<8x128xf32, #tpu.memory_space<vmem>>, %arg3: memref<8x128xf32, #tpu.memory_space<vmem>>) attributes {dimension_semantics = [#tpu.dimension_semantics<parallel>], iteration_bounds = array<i64: 2>, scalar_prefetch = 0 : i64, scratch_operands = 0 : i64, tpu.core_type = #tpu.core_type<tc>, window_params = [{transform_indices = @transform_0, window_bounds = array<i64: 3>}, {transform_indices = @transform_1, window_bounds = array<i64: 8, 128>}, {transform_indices = @transform_2, window_bounds = array<i64: 8, 128>}]} {
    %c0 = arith.constant 0 : index
    %0 = memref.load %arg1[%c0] : memref<3xf32, #tpu.memory_space<smem>>
    %c1 = arith.constant 1 : index
    %1 = memref.load %arg1[%c1] : memref<3xf32, #tpu.memory_space<smem>>
    %c2 = arith.constant 2 : index
    %2 = memref.load %arg1[%c2] : memref<3xf32, #tpu.memory_space<smem>>
    %c0_0 = arith.constant 0 : index
    %c0_1 = arith.constant 0 : index
    %3 = vector.load %arg2[%c0_0, %c0_1] : memref<8x128xf32, #tpu.memory_space<vmem>>, vector<8x128xf32>
    %4 = vector.broadcast %0 : f32 to vector<8x128xf32>
    %5 = arith.mulf %4, %3 : vector<8x128xf32>
    %6 = math.tanh %5 : vector<8x128xf32>
    %cst = arith.constant 5.000000e-01 : f32
    %7 = vector.broadcast %cst : f32 to vector<8x128xf32>
    %8 = arith.mulf %6, %7 : vector<8x128xf32>
    %cst_2 = arith.constant 5.000000e-01 : f32
    %9 = vector.broadcast %cst_2 : f32 to vector<8x128xf32>
    %10 = arith.addf %8, %9 : vector<8x128xf32>
    %11 = vector.broadcast %1 : f32 to vector<8x128xf32>
    %12 = arith.addf %3, %11 : vector<8x128xf32>
    %13 = arith.mulf %10, %12 : vector<8x128xf32>
    %14 = vector.broadcast %2 : f32 to vector<8x128xf32>
    %15 = arith.subf %13, %14 : vector<8x128xf32>
    %c0_3 = arith.constant 0 : index
    %c0_4 = arith.constant 0 : index
    %16 = vector.load %arg3[%c0_3, %c0_4] : memref<8x128xf32, #tpu.memory_space<vmem>>, vector<8x128xf32>
    tpu.vector_store %arg3[%c0_3, %c0_4], %15 {strides = array<i32>} : memref<8x128xf32, #tpu.memory_space<vmem>>, vector<8x128xf32>,
    return
  }
  func.func @transform_0(%arg0: i32) -> i32 {
    %c0_i32 = arith.constant 0 : i32
    %c0_i32_0 = arith.constant 0 : i32
    return %c0_i32 : i32
  }
  func.func @transform_1(%arg0: i32) -> (i32, i32) {
    %c0_i32 = arith.constant 0 : i32
    %c0_i32_0 = arith.constant 0 : i32
    return %arg0, %c0_i32 : i32, i32
  }
  func.func @transform_2(%arg0: i32) -> (i32, i32) {
    %c0_i32 = arith.constant 0 : i32
    %c0_i32_0 = arith.constant 0 : i32
    return %arg0, %c0_i32 : i32, i32
  }
}

</mosaic_0001>

<bundles_post_ra>
// kernel: tpu_custom_call.1
= control target key start
LH: loop header
LB: loop body
LE: loop exit
PB: predicated region body
PF: predicated region fallthrough
CT: control target
= control target key end

     0   :  { %7 = vsyncpa [#allocation5], 0  ;;  %s695_s0 = inlined_call_operand.hbm [shape: f32[3], index: 0, kind: input, shape index: {}]   ;;  %s696_s1 = inlined_call_operand.hbm [shape: f32[16,128], index: 1, kind: input, shape index: {}]   ;;  %s697_s2 = inlined_call_operand.hbm [shape: f32[16,128], index: 2, kind: output, shape index: {}]  }
   0x1   :  { %8 = vsyncpa [#allocation3], 0 }
   0x2   :  { %10 = vsyncpa [#allocation3 + $0x1], 0 }
   0x3   :  { %11 = vsyncpa [#allocation4], 0 }
   0x4   :  { %13 = vsyncpa [#allocation4 + $0x1], 0  ;;  %s490_s9 = smov 0   ;;  %s492_s10 = smov 0  }
   0x5   :  { %s494_s11 = smov 0   ;;  %s496_s12 = smov 0  }
   0x6 LB: > { %s511_s13 = sadd.s32 4294967295, %s470_s12   ;;  %s282_s14 = sadd.s32 4294967294, %s470_s12   ;;  %s470_s12 = sphi %s496_s12, %s718_s12   ;;  %s466_s11 = sphi %s494_s11, %s717_s11   ;;  %s462_s10 = sphi %s492_s10, %s716_s10   ;;  %s458_s9 = sphi %s490_s9, %s715_s9  }
   0x7   : > { %p60_p0 = scmp.ne.s32.totalorder %s462_s10, %s458_s9  ;;  %p698_p1 = scmp.eq.s32.totalorder %s511_s13, 0 }
   0x8   : > { %p90_p3 = scmp.eq.s32.totalorder %s282_s14, 1  ;;  %p283_p5 = scmp.ge.s32.totalorder %s470_s12, 1 }
   0x9   : > { %p520_p4 = por %p698_p1, %p60_p0  ;;  %p97_p7 = scmp.lt.s32.totalorder %s470_s12, 3 }
   0xa   : > { %p525_p6 = por %p90_p3, %p60_p0  ;;  %s536_s18 = sadd.s32 1, %s470_s12  }
   0xb   : > { %s701_s15 = scalar_select %p520_p4, 1, 0 }
   0xc   : > { %s702_s16 = scalar_select %p525_p6, 1, 0 }
   0xd   : > { %p530_p8 = pnand %p283_p5, %p97_p7  ;;  %s44_s19 = ssub.s32 %s470_s12, %s536_s18 }
   0xe   : > { %s47_s20 = sadd.s32 1, %s466_s11  ;;  %p549_p12 = scmp.eq.s32.totalorder %s44_s19, 0 }
   0xf   : > { %p306_p10 = pneg %p530_p8  ;;  %p54_p13 = scmp.ne.s32.totalorder %s466_s11, %s462_s10 }
  0x10   : > { %p55_p0 = scmp.eq.s32.totalorder %s470_s12, 0  ;;  %p319_p3 = scmp.lt.s32.totalorder %s470_s12, 2 }
  0x11   : > { %p545_p11 = pnand %p306_p10, %p698_p1  ;;  %s357_s25 = scalar_lea.hbm %s695_s0, 16 }
  0x12   : > { %p358_p5 = scmp.ne.s32.totalorder %s695_s0, %s357_s25  ;;  %p364_p1 = scmp.lt.u32.totalorder %s357_s25, %s695_s0 }
  0x13   : > { %p359_p7 = pneg %p545_p11 }
  0x15   : > { %p360_p10 = pnand %p359_p7, %p358_p5 }
  0x17   : > { %p361_p9 = pneg %p360_p10 }
  0x19   : > { %p366_p2 = pnand %p364_p1, %p361_p9 }
  0x1b   : > { %369 = shalt.err (!%p366_p2)
}
  0x1c   : > { %s472_s30 = smov [#allocation2]   ;;  %p56_p1 = por %p55_p0, %p54_p13 }
  0x1d   : > { %309 = dma.hbm_to_smem (!%p545_p11), %s695_s0, 16, %s472_s30, [#allocation5]  }
  0x1e   : > { %s576_s5 = scalar_select %p549_p12, %s466_s11, %s47_s20  }
  0x1f   : > { %p706_p2 = scmp.eq.s32.totalorder %s511_s13, 1  ;;  %s119_s7 = sand.u32 1, %s466_s11  }
  0x20   : > { %s287_s8 = sshll.u32 %s470_s12, 7  ;;  %s286_s14 = sshll.u32 %s119_s7, 3 }
  0x21   : > { %p588_p9 = por %p706_p2, %p54_p13  ;;  %s597_s23 = scalar_lea.hbm %s696_s1, %s287_s8 }
  0x22   : > { %s123_s20 = scalar_lea.vmem [#allocation6], %s286_s14  ;;  %p601_p11 = pnand %p319_p3, %p56_p1 }
  0x23   : > { %s707_s6 = scalar_select %p588_p9, 1, 0 }
  0x24   : > { %s130_s22 = sshll.u32 %s123_s20, 4  ;;  %s120_s25 = scalar_lea.sflag [#allocation3], %s119_s7  ;;  %s605_s22 = int_to_ptr.vmem [resolvable:$true] %s130_s22 }
  0x25   : > { %s370_s26 = scalar_lea.hbm %s597_s23, 128  ;;  %p372_p13 = pneg %p601_p11 }
  0x26   : > { %p371_p12 = scmp.ne.s32.totalorder %s597_s23, %s370_s26  ;;  %s375_s29 = scalar_lea.hbm %s696_s1, 256 }
  0x27   : > { %p376_p3 = scmp.lt.u32.totalorder %s597_s23, %s696_s1  ;;  %p377_p7 = scmp.lt.u32.totalorder %s375_s29, %s370_s26 }
  0x28   : > { %p373_p0 = pnand %p372_p13, %p371_p12  ;;  %p379_p1 = scmp.lt.u32.totalorder %s370_s26, %s597_s23 }
  0x29   : > { %p378_p10 = por %p377_p7, %p376_p3 }
  0x2a   : > { %p374_p5 = pneg %p373_p0 }
  0x2b   : > { %p380_p2 = por %p379_p1, %p378_p10 }
  0x2d   : > { %p381_p6 = pnand %p380_p2, %p374_p5 }
  0x2f   : > { %384 = shalt.err (!%p381_p6)
}
  0x30   : > { %s385_s4 = scalar_lea.vmem %s605_s22, 128  ;;  %s473_s7 = smov [#allocation6]  }
  0x31   : > { %p386_p12 = scmp.ne.s32.totalorder %s605_s22, %s385_s4  ;;  %s390_s8 = sshll.u32 %s473_s7, 4  ;;  %s391_s8 = int_to_ptr.vmem [resolvable:$false] %s390_s8 }
  0x32   : > { %s392_s14 = scalar_lea.vmem %s391_s8, 256  ;;  %p393_p4 = scmp.lt.s32.totalorder %s605_s22, %s391_s8 }
  0x33   : > { %p388_p0 = pnand %p386_p12, %p372_p13  ;;  %p394_p3 = scmp.lt.s32.totalorder %s392_s14, %s385_s4 }
  0x35   : > { %p389_p9 = pneg %p388_p0  ;;  %p395_p7 = por %p394_p3, %p393_p4 }
  0x37   : > { %p396_p10 = pnand %p395_p7, %p389_p9 }
  0x39   : > { %399 = shalt.err (!%p396_p10)
}
  0x3a   : > { %313 = dma.hbm_to_vmem [thread:$0]  (!%p601_p11), %s597_s23, 128, %s605_s22, %s120_s25  }
  0x3b   : > { %139 = sbr.rel (%p530_p8) target bundleno = 115 (0x73), region = 28  ;;  %p709_p6 = scmp.eq.s32.totalorder (!%p530_p8), %s511_s13, 0 }
  0x42   : > { %445 = dma.done.wait (%p709_p6), [#allocation5], 16   ;;  %p710_p13 = pmov %p709_p6 }
  0x43   : > { %s639_s19 = sand.u32 1, %s462_s10   ;;  %p711_p4 = scmp.ne.s32.totalorder %s701_s15, 0 }
  0x44   : > { %447 = vsyncadd (%p710_p13), [#allocation5], 4294967280  ;;  %s290_s21 = sshll.u32 %s639_s19, 3  ;;  %s146_s20 = scalar_lea.sflag [#allocation3], %s639_s19 }
  0x45   : > { %s149_s24 = scalar_lea.vmem [#allocation6], %s290_s21 }
  0x46   : > { %449 = dma.done.wait (%p711_p4), %s146_s20, 128  }
  0x47   : > { %451 = vsyncadd (%p711_p4), %s146_s20, 4294967168 }
  0x48   : > { %154 = sfence }
  0x49   : > { %s171_s17 = sld [smem:[#allocation2]]  ;;  %v174_v0 = vld [vmem:[%s149_s24] sm:$0xff]  ;;  %s292_s23 = sld [smem:[#allocation2 + $0x1]] }
  0x4a   : > { %s293_s22 = sld [smem:[#allocation2 + $0x2]]  ;;  %s170_s25 = scalar_lea.vmem [#allocation7], %s290_s21 }
  0x4b   : > { %s200_s15 = sshll.u32 %s170_s25, 4  ;;  %s295_s26 = sshll.u32 %s511_s13, 7  ;;  %s648_s15 = int_to_ptr.vmem [resolvable:$true] %s200_s15 }
  0x4c   : > { %s653_s29 = scalar_lea.hbm %s697_s2, %s295_s26  ;;  %s187_s30 = scalar_lea.sflag [#allocation4], %s639_s19 }
  0x4d   : > { %s400_s3 = scalar_lea.vmem %s648_s15, 128  ;;  %p712_p9 = scmp.ne.s32.totalorder %s707_s6, 0 }
  0x4e   : > { %p401_p8 = scmp.ne.s32.totalorder %s648_s15, %s400_s3  ;;  %s474_s13 = smov [#allocation7]  }
  0x4f   : > { %v175_v1 = vstv %s171_s17  ;;  %v180_v3 = vstv %s292_s23  ;;  %s404_s4 = sshll.u32 %s474_s13, 4  ;;  %s405_s4 = int_to_ptr.vmem [resolvable:$false] %s404_s4 }
  0x50   : > { %v176_v2 = vmul.f32 %v175_v1, %v174_v0  ;;  %v181_v6 = vadd.f32 %v180_v3, %v174_v0  ;;  %v183_v8 = vstv %s293_s22  ;;  %p402_p11 = pnand %p401_p8, %p712_p9  ;;  %s406_s7 = scalar_lea.vmem %s405_s4, 256 }
  0x51   : > { %p407_p1 = scmp.lt.s32.totalorder %s648_s15, %s405_s4  ;;  %p408_p2 = scmp.lt.s32.totalorder %s406_s7, %s400_s3 }
  0x52   : > { %355 = vtanh.f32 %v176_v2  ;;  %p403_p5 = pneg %p402_p11 }
  0x53   : > { %p409_p12 = por %p408_p2, %p407_p1 }
  0x55   : > { %p410_p0 = pnand %p409_p12, %p403_p5 }
  0x5c   : > { %v356_v4 = vpop.eup %355 }
  0x5d   : > { %v178_v5 = vmul.f32 0.5, %v356_v4 }
  0x5f   : > { %v179_v7 = vadd.f32 0.5, %v178_v5 }
  0x61   : > { %v182_v9 = vmul.f32 %v181_v6, %v179_v7 }
  0x63   : > { %v184_v10 = vsub.f32 %v182_v9, %v183_v8 }
  0x65   : > { %185 = vst [vmem:[%s170_s25] sm:$0xff] %v184_v10 }
  0x66   : > { %413 = shalt.err (!%p410_p0)
}
  0x67   : > { %s414_s8 = scalar_lea.hbm %s653_s29, 128  ;;  %s418_s21 = scalar_lea.hbm %s697_s2, 256 }
  0x68   : > { %p415_p3 = scmp.ne.s32.totalorder %s653_s29, %s414_s8  ;;  %p419_p6 = scmp.lt.u32.totalorder %s653_s29, %s697_s2 }
  0x69   : > { %p420_p13 = scmp.lt.u32.totalorder %s418_s21, %s414_s8  ;;  %p422_p8 = scmp.lt.u32.totalorder %s414_s8, %s653_s29 }
  0x6a   : > { %p416_p7 = pnand %p415_p3, %p712_p9 }
  0x6b   : > { %p421_p4 = por %p420_p13, %p419_p6 }
  0x6c   : > { %p417_p10 = pneg %p416_p7 }
  0x6d   : > { %p423_p11 = por %p422_p8, %p421_p4 }
  0x6f   : > { %p424_p5 = pnand %p423_p11, %p417_p10 }
  0x71   : > { %427 = shalt.err (!%p424_p5)
}
  0x72   : > { %304 = dma.vmem_to_hbm [thread:$0]  (%p712_p9), %s648_s15, 128, %s653_s29, %s187_s30  }
  0x73 PF: > { %s212_s17 = sand.u32 1, %s458_s9   ;;  %p713_p1 = scmp.ne.s32.totalorder %s702_s16, 0 }
  0x74   : > { %p714_p2 = scmp.ge.s32.totalorder %s470_s12, 2  ;;  %s213_s23 = scalar_lea.sflag [#allocation4], %s212_s17 }
  0x76   : > { %p315_p12 = pnand %p714_p2, %p713_p1 }
  0x78   : > { %453 = dma.done.wait (!%p315_p12), %s213_s23, 128  }
  0x79   : > { %455 = vsyncadd (!%p315_p12), %s213_s23, 4294967168  ;;  %p16_p0 = scmp.ge.s32.totalorder %s536_s18, 4   ;;  %s715_s9 = smov %s462_s10 }
  0x7a   : > { %s716_s10 = smov %s466_s11  ;;  %s717_s11 = smov %s576_s5 }
  0x7b   : > { %s718_s12 = smov %s536_s18  ;;  %18 = sbr.rel (!%p16_p0) target bundleno = 6 (0x6), region = 78 }
  0x82   :  { %218 = vsyncpa [#allocation3], 1 }
  0x83   :  { %220 = vsyncpa [#allocation3 + $0x1], 1 }
  0x84   :  { %221 = vsyncpa [#allocation4], 1 }
  0x85   :  { %223 = vsyncpa [#allocation4 + $0x1], 1 }
  0x86   :  { %224 = vsyncpa [#allocation5], 1 }
  0x87   :  { %226 = vsyncpa [#allocation5 + $0x1], 1 }

</bundles_post_ra>
